<compile_context>
chip_gen: v7x
topology: tpu7x:2x2x1
jax: 0.10.0
libtpu: 0.0.40
codegen_flags: <defaults>
</compile_context>

<pallas_src>
import functools

import jax
import jax.numpy as jnp
from jax.experimental import pallas as pl
from jax.experimental.pallas import tpu as pltpu

_MIB = 1024 * 1024


def _round_up(v: int, m: int) -> int:
    return -(-v // m) * m


def _sublane_granule(dtype) -> int:
    # Minimum second-minor (sublane) granule per dtype packing: f32->8,
    # bf16->16, int8/fp8->32.
    return {4: 8, 2: 16, 1: 32}[jnp.dtype(dtype).itemsize]


def _vmem_limit_bytes() -> int:
    # Generation-aware VMEM ceiling (v5e/v6e: 128 MiB physical, v7x: 64 MiB).
    phys = 64 * _MIB
    try:
        info = pltpu.get_tpu_info()
        phys = int(getattr(info, "vmem_capacity_bytes", phys) or phys)
    except Exception:
        pass
    return min((phys * 3) // 4, 96 * _MIB)


def _largest_divisor_tile(dim: int, cap: int, granule: int) -> int:
    """Largest t <= cap with t % granule == 0 and dim % t == 0 (dim % granule == 0)."""
    cap = max(granule, min(cap, dim))
    cap -= cap % granule
    for t in range(cap, granule - 1, -granule):
        if dim % t == 0:
            return t
    return granule


# ----------------------------- kernels ------------------------------------


def _linear_kernel_fullk(x_ref, wt_ref, b_ref, o_ref):
    # x: (tm, Kp)  wt: (Kp, tn)  b: (1, tn)  o: (tm, tn). Single-shot MXU
    # contraction, bias fused; no reduction axis, no scratch.
    o_ref[...] = (
        jnp.dot(x_ref[...], wt_ref[...], preferred_element_type=jnp.float32)
        + b_ref[...].astype(jnp.float32)
    ).astype(o_ref.dtype)


def _linear_kernel_ktiled_f32(x_ref, wt_ref, b_ref, o_ref):
    # f32 output: o_ref's index map ignores k, so the block is resident across
    # the K axis -> accumulate directly into it (init with bias at k == 0).
    @pl.when(pl.program_id(2) == 0)
    def _():
        o_ref[...] = jnp.broadcast_to(b_ref[...].astype(jnp.float32), o_ref.shape)

    o_ref[...] += jnp.dot(
        x_ref[...], wt_ref[...], preferred_element_type=jnp.float32
    )


def _linear_kernel_ktiled_acc(x_ref, wt_ref, b_ref, o_ref, acc_ref):
    # Generic-output-dtype path: f32 VMEM accumulator, cast on the last k step.
    k = pl.program_id(2)

    @pl.when(k == 0)
    def _():
        acc_ref[...] = jnp.zeros_like(acc_ref)

    acc_ref[...] += jnp.dot(
        x_ref[...], wt_ref[...], preferred_element_type=jnp.float32
    )

    @pl.when(k == pl.num_programs(2) - 1)
    def _():
        o_ref[...] = (acc_ref[...] + b_ref[...].astype(jnp.float32)).astype(o_ref.dtype)


# ----------------------------- wrapper -------------------------------------


def prepare_linear_weight(w):
    """One-time parameter setup (hoisted out of the per-call path):
    nn.Linear weight (out_features, in_features) -> transposed, granule-padded
    (Kp, Np) so the kernel feeds the MXU a plain (tm,tk)@(tk,tn) contraction."""
    out_f, in_f = w.shape
    Kp = _round_up(in_f, 128)
    Np = _round_up(out_f, 128)
    return jnp.pad(w.T, ((0, Kp - in_f), (0, Np - out_f)))


@functools.partial(jax.jit, static_argnames=("tm", "tn", "tk"))
def linear_pallas(x, wt_padded, b, *, tm=None, tn=None, tk=None):
    """y = x @ w.T + b (torch.nn.Linear semantics).

    x: (B, in_features)
    wt_padded: (Kp, Np) from prepare_linear_weight(w)  (w: (out_f, in_f))
    b: (out_features,)
    """
    B, in_f = x.shape
    Kp, Np = wt_padded.shape
    out_f = b.shape[0]
    assert Kp == _round_up(in_f, 128) and Np == _round_up(out_f, 128)
    assert x.dtype == wt_padded.dtype

    itemsize = jnp.dtype(x.dtype).itemsize
    m_gran = _sublane_granule(x.dtype)
    Mp = _round_up(B, m_gran)

    vmem_limit = _vmem_limit_bytes()
    budget = vmem_limit - 8 * _MIB

    # Tile caps; shrink (K first, then N, then M) if the double-buffered
    # footprint exceeds the generation-aware budget.
    tm_cap = tm if tm is not None else 512
    tn_cap = tn if tn is not None else 512
    tk_cap = tk if tk is not None else 2048

    def pick(mc, nc, kc):
        return (
            _largest_divisor_tile(Mp, mc, m_gran),
            _largest_divisor_tile(Np, nc, 128),
            _largest_divisor_tile(Kp, kc, 128),
        )

    def footprint(_tm, _tn, _tk):
        # double-buffered x, W, bias + double-buffered output + worst-case acc
        return (
            2 * (_tm * _tk + _tk * _tn + _tn) * itemsize
            + 2 * _tm * _tn * itemsize
            + _tm * _tn * 4
        )

    tm_, tn_, tk_ = pick(tm_cap, tn_cap, tk_cap)
    for _ in range(16):
        tm_, tn_, tk_ = pick(tm_cap, tn_cap, tk_cap)
        if footprint(tm_, tn_, tk_) <= budget:
            break
        if tk_cap > 128:
            tk_cap = max(128, tk_cap // 2)
        elif tn_cap > 128:
            tn_cap = max(128, tn_cap // 2)
        else:
            tm_cap = max(m_gran, tm_cap // 2)

    # Per-call padding of the (small) activation / bias only; identity (traced
    # away) when the shapes are already aligned.
    xp = jnp.pad(x, ((0, Mp - B), (0, Kp - in_f)))
    bp = jnp.pad(b, (0, Np - out_f)).reshape(1, Np)

    # Accurate tiled-traffic estimate: x re-read Np/tn times, W re-read Mp/tm.
    cost = pl.CostEstimate(
        flops=2 * Mp * Np * Kp,
        transcendentals=0,
        bytes_accessed=(
            Mp * Kp * (Np // tn_) * itemsize
            + Kp * Np * (Mp // tm_) * itemsize
            + Mp * Np * itemsize
            + Np * itemsize
        ),
    )

    out_shape = jax.ShapeDtypeStruct((Mp, Np), x.dtype)

    if tk_ == Kp:
        # Full-K tiles fit VMEM: drop the reduction axis entirely.
        grid = (Mp // tm_, Np // tn_)
        out_padded = pl.pallas_call(
            _linear_kernel_fullk,
            out_shape=out_shape,
            grid_spec=pltpu.PrefetchScalarGridSpec(
                num_scalar_prefetch=0,
                grid=grid,
                in_specs=[
                    pl.BlockSpec((tm_, Kp), lambda i, j: (i, 0)),   # x
                    pl.BlockSpec((Kp, tn_), lambda i, j: (0, j)),   # W^T
                    pl.BlockSpec((1, tn_), lambda i, j: (0, j)),    # bias
                ],
                out_specs=pl.BlockSpec((tm_, tn_), lambda i, j: (i, j)),
            ),
            compiler_params=pltpu.CompilerParams(
                dimension_semantics=("parallel", "parallel"),
                vmem_limit_bytes=vmem_limit,
            ),
            cost_estimate=cost,
        )(xp, wt_padded, bp)
    else:
        # K-tiled reduction, K innermost.
        grid = (Mp // tm_, Np // tn_, Kp // tk_)
        in_specs = [
            pl.BlockSpec((tm_, tk_), lambda i, j, k: (i, k)),   # x
            pl.BlockSpec((tk_, tn_), lambda i, j, k: (k, j)),   # W^T
            pl.BlockSpec((1, tn_), lambda i, j, k: (0, j)),     # bias
        ]
        out_spec = pl.BlockSpec((tm_, tn_), lambda i, j, k: (i, j))
        compiler_params = pltpu.CompilerParams(
            dimension_semantics=("parallel", "parallel", "arbitrary"),
            vmem_limit_bytes=vmem_limit,
        )
        if jnp.dtype(x.dtype) == jnp.float32:
            # Accumulate directly into the resident f32 output block.
            out_padded = pl.pallas_call(
                _linear_kernel_ktiled_f32,
                out_shape=out_shape,
                grid_spec=pltpu.PrefetchScalarGridSpec(
                    num_scalar_prefetch=0, grid=grid,
                    in_specs=in_specs, out_specs=out_spec),
                compiler_params=compiler_params,
                cost_estimate=cost,
            )(xp, wt_padded, bp)
        else:
            out_padded = pl.pallas_call(
                _linear_kernel_ktiled_acc,
                out_shape=out_shape,
                grid_spec=pltpu.PrefetchScalarGridSpec(
                    num_scalar_prefetch=0, grid=grid,
                    in_specs=in_specs, out_specs=out_spec,
                    scratch_shapes=[pltpu.VMEM((tm_, tn_), jnp.float32)]),
                compiler_params=compiler_params,
                cost_estimate=cost,
            )(xp, wt_padded, bp)

    return out_padded[:B, :out_f]


if __name__ == "__main__":
    # Small shapes consistent with the module: in_features=32, out_features=16.
    batch, in_features, out_features = 8, 32, 16

    key = jax.random.PRNGKey(0)
    kx, kw, kb = jax.random.split(key, 3)

    bound = 1.0 / jnp.sqrt(jnp.float32(in_features))
    x = jax.random.normal(kx, (batch, in_features), dtype=jnp.float32)
    w = jax.random.uniform(kw, (out_features, in_features),
                           minval=-bound, maxval=bound, dtype=jnp.float32)
    b = jax.random.uniform(kb, (out_features,),
                           minval=-bound, maxval=bound, dtype=jnp.float32)

    wt = prepare_linear_weight(w)          # one-time parameter setup
    y = linear_pallas(x, wt, b)            # full-K (no reduction axis) path
    jax.block_until_ready(y)

    y_ref = jnp.dot(x, w.T, precision=jax.lax.Precision.HIGHEST) + b
    assert y.shape == (batch, out_features)
    assert jnp.allclose(y, y_ref, atol=1e-5, rtol=1e-5), "mismatch vs reference"

    # Larger, awkward shape: exercises granule-only padding, the divisor-based
    # tile picker, and the K-tiled (accumulate-into-o_ref) path.
    k2x, k2w, k2b = jax.random.split(jax.random.PRNGKey(1), 3)
    B2, K2, N2 = 260, 2304, 640
    x2 = jax.random.normal(k2x, (B2, K2), dtype=jnp.float32)
    w2 = jax.random.normal(k2w, (N2, K2), dtype=jnp.float32) * 0.02
    b2 = jax.random.normal(k2b, (N2,), dtype=jnp.float32)
    wt2 = prepare_linear_weight(w2)
    y2 = linear_pallas(x2, wt2, b2)
    jax.block_until_ready(y2)
    y2_ref = jnp.dot(x2, w2.T, precision=jax.lax.Precision.HIGHEST) + b2
    assert jnp.allclose(y2, y2_ref, atol=2e-3, rtol=2e-3), "large-shape mismatch"

    print("KERNEL_OK")
</pallas_src>

<mosaic_0001>
module attributes {stable_mosaic.version = 11 : i64} {
  func.func @_linear_kernel_fullk(%arg0: i32, %arg1: i32, %arg2: memref<8x128xf32, #tpu.memory_space<vmem>>, %arg3: memref<128x128xf32, #tpu.memory_space<vmem>>, %arg4: memref<1x128xf32, #tpu.memory_space<vmem>>, %arg5: memref<8x128xf32, #tpu.memory_space<vmem>>) attributes {dimension_semantics = [#tpu.dimension_semantics<parallel>, #tpu.dimension_semantics<parallel>], iteration_bounds = array<i64: 1, 1>, scalar_prefetch = 0 : i64, scratch_operands = 0 : i64, tpu.core_type = #tpu.core_type<tc>, window_params = [{transform_indices = @transform_0, window_bounds = array<i64: 8, 128>}, {transform_indices = @transform_1, window_bounds = array<i64: 128, 128>}, {transform_indices = @transform_2, window_bounds = array<i64: 1, 128>}, {transform_indices = @transform_3, window_bounds = array<i64: 8, 128>}]} {
    %c0 = arith.constant 0 : index
    %c0_0 = arith.constant 0 : index
    %0 = vector.load %arg2[%c0, %c0_0] : memref<8x128xf32, #tpu.memory_space<vmem>>, vector<8x128xf32>
    %c0_1 = arith.constant 0 : index
    %c0_2 = arith.constant 0 : index
    %1 = vector.load %arg3[%c0_1, %c0_2] : memref<128x128xf32, #tpu.memory_space<vmem>>, vector<128x128xf32>
    %cst = arith.constant dense<0.000000e+00> : vector<8x128xf32>
    %2 = tpu.matmul %0, %1, %cst {dimension_numbers = #tpu.dot_dimension_numbers<[1], [0], [0], [1], [0, 0, 1, 1], [], []>} : vector<8x128xf32>, vector<128x128xf32>, vector<8x128xf32> -> vector<8x128xf32>
    %c0_3 = arith.constant 0 : index
    %c0_4 = arith.constant 0 : index
    %3 = vector.load %arg4[%c0_3, %c0_4] : memref<1x128xf32, #tpu.memory_space<vmem>>, vector<1x128xf32>
    %4 = vector.broadcast %3 : vector<1x128xf32> to vector<8x128xf32>
    %5 = arith.addf %2, %4 : vector<8x128xf32>
    %c0_5 = arith.constant 0 : index
    %c0_6 = arith.constant 0 : index
    %6 = vector.load %arg5[%c0_5, %c0_6] : memref<8x128xf32, #tpu.memory_space<vmem>>, vector<8x128xf32>
    tpu.vector_store %arg5[%c0_5, %c0_6], %5 {strides = array<i32>} : memref<8x128xf32, #tpu.memory_space<vmem>>, vector<8x128xf32>,
    return
  }
  func.func @transform_0(%arg0: i32, %arg1: i32) -> (i32, i32) {
    %c0_i32 = arith.constant 0 : i32
    %c0_i32_0 = arith.constant 0 : i32
    return %arg0, %c0_i32 : i32, i32
  }
  func.func @transform_1(%arg0: i32, %arg1: i32) -> (i32, i32) {
    %c0_i32 = arith.constant 0 : i32
    %c0_i32_0 = arith.constant 0 : i32
    return %c0_i32, %arg1 : i32, i32
  }
  func.func @transform_2(%arg0: i32, %arg1: i32) -> (i32, i32) {
    %c0_i32 = arith.constant 0 : i32
    %c0_i32_0 = arith.constant 0 : i32
    return %c0_i32, %arg1 : i32, i32
  }
  func.func @transform_3(%arg0: i32, %arg1: i32) -> (i32, i32) {
    %c0_i32 = arith.constant 0 : i32
    return %arg0, %arg1 : i32, i32
  }
}

</mosaic_0001>

<bundles_post_ra>
// kernel: linear_pallas.1
= control target key start
LH: loop header
LB: loop body
LE: loop exit
PB: predicated region body
PF: predicated region fallthrough
CT: control target
= control target key end

     0   :  { %8 = vsyncpa [#allocation3], 0  ;;  %s328_s0 = inlined_call_operand.vmem [shape: f32[8,128], index: 0, kind: input, shape index: {}]   ;;  %s329_s1 = inlined_call_operand.hbm [shape: f32[128,128], index: 1, kind: input, shape index: {}]   ;;  %s330_s2 = inlined_call_operand.vmem [shape: f32[1,128], index: 2, kind: input, shape index: {}]   ;;  %s331_s3 = inlined_call_operand.hbm [shape: f32[8,128], index: 3, kind: output, shape index: {}]  }
   0x1   :  { %9 = vsyncpa [#allocation4], 0  ;;  %s271_s12 = smov [#allocation2]   ;;  %s223_s16 = scalar_lea.hbm %s329_s1, 2048 }
   0x2   :  { %s17_s13 = sshll.u32 %s271_s12, 4  ;;  %p224_p0 = scmp.ne.s32.totalorder %s329_s1, %s223_s16  ;;  %s18_s13 = int_to_ptr.vmem [resolvable:$true] %s17_s13 }
   0x3   :  { %p227_p1 = scmp.lt.u32.totalorder %s223_s16, %s329_s1 }
   0x5   :  { %p229_p2 = pnand %p227_p1, %p224_p0 }
   0x7   :  { %232 = shalt.err (!%p229_p2)
}
   0x8   :  { %s233_s21 = scalar_lea.vmem %s18_s13, 2048  ;;  %p238_p4 = scmp.lt.s32.totalorder %s18_s13, %s18_s13 }
   0x9   :  { %p234_p3 = scmp.ne.s32.totalorder %s18_s13, %s233_s21  ;;  %p239_p5 = scmp.lt.s32.totalorder %s233_s21, %s233_s21 }
   0xb   :  { %p240_p6 = por %p239_p5, %p238_p4 }
   0xd   :  { %p241_p7 = pnand %p240_p6, %p234_p3 }
   0xf   :  { %244 = shalt.err (!%p241_p7)
}
  0x10   :  { %s272_s22 = smov 128   ;;  %s273_s23 = smov 8  }
  0x11   :  { %23 = dma.hbm_to_vmem [thread:$0]  %s329_s1, 2048, %s18_s13, [#allocation3], %s272_s22, %s272_s22, %s273_s23  }
  0x12   :  { %267 = dma.done.wait [#allocation3], 2048  }
  0x13   :  { %268 = vsyncadd [#allocation3], 4294965248  ;;  %v274_v0 = vmov 0.0|0.0   ;;  %vm275_vm0 = vmmov 0   ;;  %v276_v1 = vmov 0.0   ;;  %v30_v2 = vld [vmem:[#allocation2] sm:$0xff] }
  0x14   :  { %192 = vmatprep.subr.bf16.mxu0 %v274_v0  ;;  %189 = vmatprep.mubr.msk.f32.mxu0 %vm275_vm0, %v276_v1  ;;  %v31_v3 = vld [vmem:[#allocation2 + $0x8] sm:$0xff]  ;;  %v32_v4 = vld [vmem:[#allocation2 + $0x10] sm:$0xff]  ;;  %v33_v6 = vld [vmem:[#allocation2 + $0x18] sm:$0xff]  ;;  %s277_s29 = smov [#allocation5]  }
  0x15   :  { %v193_v5 = vpack.c.bf16 %v31_v3, %v30_v2  ;;  %v196_v7 = vpack.c.bf16 %v33_v6, %v32_v4  ;;  %v34_v8 = vld [vmem:[#allocation2 + $0x20] sm:$0xff]  ;;  %v35_v9 = vld [vmem:[#allocation2 + $0x28] sm:$0xff]  ;;  %v36_v11 = vld [vmem:[#allocation2 + $0x30] sm:$0xff]  ;;  %s130_s30 = sshll.u32 %s277_s29, 4  ;;  %s131_s30 = int_to_ptr.vmem [resolvable:$true] %s130_s30 }
  0x16   :  { %v199_v10 = vpack.c.bf16 %v35_v9, %v34_v8  ;;  %v37_v12 = vld [vmem:[#allocation2 + $0x38] sm:$0xff]  ;;  %v38_v14 = vld [vmem:[#allocation2 + $0x40] sm:$0xff]  ;;  %v39_v15 = vld [vmem:[#allocation2 + $0x48] sm:$0xff]  ;;  %s245_s4 = scalar_lea.vmem %s131_s30, 128  ;;  %p250_p9 = scmp.lt.s32.totalorder %s131_s30, %s131_s30 }
  0x17   :  { %194 = vmatpush3.bf16.msra.mxu0 %v193_v5  ;;  %v202_v13 = vpack.c.bf16 %v37_v12, %v36_v11  ;;  %v205_v16 = vpack.c.bf16 %v39_v15, %v38_v14  ;;  %v40_v17 = vld [vmem:[#allocation2 + $0x50] sm:$0xff]  ;;  %v41_v18 = vld [vmem:[#allocation2 + $0x58] sm:$0xff]  ;;  %v42_v20 = vld [vmem:[#allocation2 + $0x60] sm:$0xff]  ;;  %p246_p8 = scmp.ne.s32.totalorder %s131_s30, %s245_s4  ;;  %p251_p10 = scmp.lt.s32.totalorder %s245_s4, %s245_s4 }
  0x18   :  { %195 = vmatprep.subr.bf16.mxu0 %v274_v0  ;;  %v208_v19 = vpack.c.bf16 %v41_v18, %v40_v17  ;;  %v43_v21 = vld [vmem:[#allocation2 + $0x68] sm:$0xff]  ;;  %v44_v23 = vld [vmem:[#allocation2 + $0x70] sm:$0xff]  ;;  %v45_v24 = vld [vmem:[#allocation2 + $0x78] sm:$0xff] }
  0x19   :  { %v211_v22 = vpack.c.bf16 %v43_v21, %v42_v20  ;;  %v214_v25 = vpack.c.bf16 %v45_v24, %v44_v23  ;;  %v29_v26 = vld [vmem:[%s328_s0] sm:$0xff]  ;;  %p252_p11 = por %p251_p10, %p250_p9 }
  0x1a   :  { %v139_v27 = vld [vmem:[%s330_s2] ss:$0 sm:$0xff] }
  0x1b   :  { %197 = vmatpush3.bf16.msra.mxu0 %v196_v7  ;;  %p253_p12 = pnand %p252_p11, %p246_p8 }
  0x1c   :  { %198 = vmatprep.subr.bf16.mxu0 %v274_v0 }
  0x1f   :  { %200 = vmatpush3.bf16.msra.mxu0 %v199_v10 }
  0x20   :  { %201 = vmatprep.subr.bf16.mxu0 %v274_v0 }
  0x23   :  { %203 = vmatpush3.bf16.msra.mxu0 %v202_v13 }
  0x24   :  { %204 = vmatprep.subr.bf16.mxu0 %v274_v0 }
  0x27   :  { %206 = vmatpush3.bf16.msra.mxu0 %v205_v16 }
  0x28   :  { %207 = vmatprep.subr.bf16.mxu0 %v274_v0 }
  0x2b   :  { %209 = vmatpush3.bf16.msra.mxu0 %v208_v19 }
  0x2c   :  { %210 = vmatprep.subr.bf16.mxu0 %v274_v0 }
  0x2f   :  { %212 = vmatpush3.bf16.msra.mxu0 %v211_v22 }
  0x30   :  { %213 = vmatprep.subr.bf16.mxu0 %v274_v0 }
  0x33   :  { %215 = vmatpush3.bf16.msra.mxu0 %v214_v25 }
  0x36   :  { %190 = vmatmul.mubr.f32.vlgmr.msra.gmra.mrb[0].mxu0 %v29_v26 }
 0x109   :  { %v119_v28 = vpop.f32.mrb[0].mxu0 }
 0x10a   :  { %v120_v29 = vadd.f32 %v139_v27, %v119_v28  ;;  %v191_v30 = vpop.f32.mrb[1].mxu0 }
 0x10c   :  { %123 = vst [vmem:[#allocation5] sm:$0xff] %v120_v29 }
 0x10d   :  { %256 = shalt.err (!%p253_p12)
}
 0x10e   :  { %s257_s6 = scalar_lea.hbm %s331_s3, 128 }
 0x10f   :  { %p258_p13 = scmp.ne.s32.totalorder %s331_s3, %s257_s6  ;;  %p261_p0 = scmp.lt.u32.totalorder %s257_s6, %s331_s3 }
 0x111   :  { %p263_p1 = pnand %p261_p0, %p258_p13 }
 0x113   :  { %266 = shalt.err (!%p263_p1)
}
 0x114   :  { %133 = dma.vmem_to_hbm [thread:$0]  %s131_s30, 128, %s331_s3, [#allocation4]  }
 0x115   :  { %269 = dma.done.wait [#allocation4], 128  }
 0x116   :  { %270 = vsyncadd [#allocation4], 4294967168 }
 0x117   :  { %137 = vsyncpa [#allocation3], 1 }
 0x118   :  { %138 = vsyncpa [#allocation4], 1 }

</bundles_post_ra>
